<compile_context>
chip_gen: v5e
topology: v5e:2x2
jax: 0.10.0
libtpu: 0.0.40
codegen_flags: <defaults>
</compile_context>

<pallas_src>
import functools
import math

import jax
import jax.numpy as jnp
from jax import lax
from jax.experimental import pallas as pl
from jax.experimental.pallas import tpu as pltpu

LOG2PI = math.log(2.0 * math.pi)
ACTNORM_LOG_SCALE_FACTOR = 3.0
CONV2DZEROS_LOG_SCALE_FACTOR = 1.0


def _prior_kernel(z_ref, c2_ref, b_ref, eps_ref, logp_ref, *,
                  hw, lane_tile, mask_tail):
    """Conv2dZeros epilogue (scale pre-folded into weights) + Gaussian prior.

    Block shapes:
      z_ref   : (RB, 1, C, T)  z2 half, selected by the BlockSpec index_map
      c2_ref  : (RB, 2, C, T)  raw conv2 output; half 0 = mean, half 1 = log_std
      b_ref   : (2,  C, 1)     bias * exp(log_scale), per half / channel
      eps_ref : (RB, C, T)
      logp_ref: (RB, 1, 1)     resident f32 accumulator across the lane-tile axis
    """
    t = pl.program_id(1)

    z2 = z_ref[:, 0, :, :].astype(jnp.float32)          # (RB, C, T)
    cm = c2_ref[:, 0, :, :].astype(jnp.float32)          # (RB, C, T)
    cs = c2_ref[:, 1, :, :].astype(jnp.float32)          # (RB, C, T)
    bm = b_ref[0, :, :].astype(jnp.float32)[None]        # (1, C, 1)
    bs = b_ref[1, :, :].astype(jnp.float32)[None]        # (1, C, 1)

    # Conv2dZeros epilogue: exp(log_scale) already folded into the conv
    # weights and into the bias, so only one broadcast add per half remains.
    mean = cm + bm
    log_std = cs + bs

    eps = (z2 - mean) * jnp.exp(-log_std)                 # (RB, C, T)
    eps_ref[...] = eps.astype(eps_ref.dtype)

    # Gaussian log-density with the -0.5*log(2*pi) constant factored out
    # (added once per batch element in the wrapper).
    contrib = eps * eps + 2.0 * log_std                   # (RB, C, T)
    if mask_tail:
        # Last lane tile may extend past HW; those lanes contain garbage
        # padding and must contribute exactly 0 to the reduction.
        lane = lax.broadcasted_iota(jnp.int32, contrib.shape, 2)
        contrib = jnp.where(lane < (hw - t * lane_tile), contrib, 0.0)
    partial = jnp.sum(contrib, axis=(1, 2), keepdims=True)  # (RB, 1, 1)

    @pl.when(t == 0)
    def _():
        logp_ref[...] = jnp.zeros_like(logp_ref)

    logp_ref[...] += -0.5 * partial


def _lane_tile(hw, target=2048):
    """Pick the lane tile.  Returns (tile, needs_tail_mask)."""
    if hw % 128 == 0:
        t = min(hw, target)
        t -= t % 128
        while hw % t:
            t -= 128
        if t == hw or t >= 512:
            return t, False            # exact divisor, lane-dense, no masking
    if hw <= target:
        return hw, False               # block dim == full array dim: always legal
    return target, True                # partial last tile: mask lanes in-kernel


def _batch_block(batch, per_batch_bytes, max_bytes=6 << 20):
    """Largest divisor of `batch` that keeps >= 2 parallel grid steps (v7x
    megacore) and keeps the per-step block bytes modest."""
    rb = 1
    for cand in range(1, batch + 1):
        if batch % cand:
            continue
        if batch >= 2 and batch // cand < 2:
            break
        if cand * per_batch_bytes > max_bytes:
            break
        rb = cand
    return rb


def split2d_forward(z, logdet, params):
    """Split2d.forward(z, logdet) -> (z1, logdet + logp(z2), eps)."""
    B, C2, H, W = z.shape
    assert C2 % 2 == 0
    C = C2 // 2
    HW = H * W
    io_dtype = z.dtype

    z1 = z[:, :C]

    # ---- conv sub-network (XLA/MXU): Conv2d -> ActNorm -> ReLU -> conv2 ----
    an_b = params["actnorm_bias"].reshape(1, C2, 1, 1).astype(jnp.float32)
    an_ls = params["actnorm_log_scale"].reshape(1, C2, 1, 1).astype(jnp.float32)
    scale2 = jnp.exp(params["conv2_log_scale"].reshape(C2).astype(jnp.float32)
                     * CONV2DZEROS_LOG_SCALE_FACTOR)
    # Fold the Conv2dZeros per-output-channel scale into its weights; the bias
    # is pre-multiplied so the kernel only does one add per half.
    w2 = params["conv2_weight"].astype(jnp.float32) * scale2[:, None, None, None]
    bias2 = (params["conv2_bias"].reshape(C2).astype(jnp.float32) * scale2
             ).reshape(2, C, 1)

    x = jnp.pad(z1, ((0, 0), (0, 0), (1, 1), (1, 1)), mode="edge")
    h = lax.conv_general_dilated(x, params["conv1_weight"], (1, 1), "VALID",
                                 dimension_numbers=("NCHW", "OIHW", "NCHW"))
    h = (h + an_b) * jnp.exp(an_ls * ACTNORM_LOG_SCALE_FACTOR)   # ActNorm
    h = jnp.maximum(h, 0.0)                                      # ReLU
    x = jnp.pad(h, ((0, 0), (0, 0), (1, 1), (1, 1)), mode="edge")
    c2 = lax.conv_general_dilated(x, w2, (1, 1), "VALID",
                                  dimension_numbers=("NCHW", "OIHW", "NCHW"))

    # ---- free (metadata-only) views; halves selected by BlockSpec ----------
    z4 = z.reshape(B, 2, C, HW)          # half 1 = z2
    c4 = c2.reshape(B, 2, C, HW)         # half 0 = mean rows, half 1 = log_std
    c_item = jnp.dtype(c4.dtype).itemsize
    z_item = jnp.dtype(io_dtype).itemsize

    T, mask_tail = _lane_tile(HW)
    num_t = pl.cdiv(HW, T)
    per_batch = T * C * 2 * z_item + T * 2 * C * c_item   # z2 in + eps out + c2 in
    RB = _batch_block(B, per_batch)
    grid = (B // RB, num_t)

    # Explicit scoped-VMEM budget: covers double-buffered blocks everywhere
    # (v5e 16 MiB default, v6e 32 MiB, v7x 64 MiB physical).
    est_vmem = 2 * (RB * per_batch + 2 * C * 4) + (1 << 20)
    try:
        cap = int(pltpu.get_tpu_info().vmem_capacity_bytes)
    except Exception:
        cap = 64 << 20
    vmem_limit = int(min(3 * cap // 4, max(32 << 20, 2 * est_vmem)))

    cost = pl.CostEstimate(
        flops=8 * B * C * HW,
        transcendentals=B * C * HW,
        bytes_accessed=B * C * HW * 2 * z_item + B * 2 * C * HW * c_item)

    kernel = functools.partial(_prior_kernel, hw=HW, lane_tile=T,
                               mask_tail=mask_tail)

    eps_flat, logp = pl.pallas_call(
        kernel,
        out_shape=(jax.ShapeDtypeStruct((B, C, HW), io_dtype),
                   jax.ShapeDtypeStruct((B, 1, 1), jnp.float32)),
        grid_spec=pltpu.PrefetchScalarGridSpec(
            num_scalar_prefetch=0,
            grid=grid,
            in_specs=[
                pl.BlockSpec((RB, 1, C, T), lambda b, t: (b, 1, 0, t)),  # z2 half
                pl.BlockSpec((RB, 2, C, T), lambda b, t: (b, 0, 0, t)),  # conv2 out
                pl.BlockSpec((2, C, 1), lambda b, t: (0, 0, 0)),         # scaled bias
            ],
            out_specs=(
                pl.BlockSpec((RB, C, T), lambda b, t: (b, 0, t)),        # eps
                pl.BlockSpec((RB, 1, 1), lambda b, t: (b, 0, 0)),        # logp partials
            ),
        ),
        compiler_params=pltpu.CompilerParams(
            dimension_semantics=("parallel", "arbitrary"),
            vmem_limit_bytes=vmem_limit),
        cost_estimate=cost,
    )(z4, c4, bias2)

    # Finish in f32 outside: add the factored-out normalization constant once
    # per batch element.
    logp = logp.reshape(B) - 0.5 * LOG2PI * (C * HW)
    logdet_out = logdet.astype(jnp.float32) + logp
    eps = eps_flat.reshape(B, C, H, W)
    return z1, logdet_out, eps


def _reference(z, logdet, params):
    """Pure-JAX reference matching the PyTorch Split2d.forward."""
    B, C2, H, W = z.shape
    C = C2 // 2
    z1, z2 = z[:, :C], z[:, C:]

    x = jnp.pad(z1, ((0, 0), (0, 0), (1, 1), (1, 1)), mode="edge")
    h = lax.conv_general_dilated(x, params["conv1_weight"], (1, 1), "VALID",
                                 dimension_numbers=("NCHW", "OIHW", "NCHW"))
    h = (h + params["actnorm_bias"].reshape(1, C2, 1, 1)) * jnp.exp(
        params["actnorm_log_scale"].reshape(1, C2, 1, 1) * ACTNORM_LOG_SCALE_FACTOR)
    h = jnp.maximum(h, 0.0)
    x = jnp.pad(h, ((0, 0), (0, 0), (1, 1), (1, 1)), mode="edge")
    out = lax.conv_general_dilated(x, params["conv2_weight"], (1, 1), "VALID",
                                   dimension_numbers=("NCHW", "OIHW", "NCHW"))
    out = (out + params["conv2_bias"].reshape(1, C2, 1, 1)) * jnp.exp(
        params["conv2_log_scale"].reshape(1, C2, 1, 1) * CONV2DZEROS_LOG_SCALE_FACTOR)

    mean, log_std = out[:, :C], out[:, C:]
    logps = -0.5 * (LOG2PI + 2.0 * log_std
                    + (z2 - mean) ** 2 * jnp.exp(-2.0 * log_std))
    eps = (z2 - mean) * jnp.exp(-log_std)
    return z1, logdet + logps.sum(axis=(1, 2, 3)), eps


if __name__ == "__main__":
    B, in_channels, H, W = 2, 8, 16, 16     # Split2d(in_channels=8); z: (B, 8, 16, 16)
    C = in_channels // 2

    key = jax.random.PRNGKey(0)
    k = jax.random.split(key, 8)

    z = jax.random.normal(k[0], (B, in_channels, H, W), jnp.float32)
    logdet = jax.random.normal(k[1], (B,), jnp.float32)

    # Deterministic synthetic parameters (module __init__ shapes; non-zero so
    # the ActNorm / Conv2dZeros math is exercised, not the trivial zero init).
    params = {
        "conv1_weight": 0.05 * jax.random.normal(k[2], (in_channels, C, 3, 3), jnp.float32),
        "actnorm_bias": 0.05 * jax.random.normal(k[3], (in_channels,), jnp.float32),
        "actnorm_log_scale": 0.05 * jax.random.normal(k[4], (in_channels,), jnp.float32),
        "conv2_weight": 0.05 * jax.random.normal(k[5], (in_channels, in_channels, 3, 3), jnp.float32),
        "conv2_bias": 0.10 * jax.random.normal(k[6], (in_channels,), jnp.float32),
        "conv2_log_scale": 0.10 * jax.random.normal(k[7], (in_channels,), jnp.float32),
    }

    z1_out, logdet_out, eps = split2d_forward(z, logdet, params)
    jax.block_until_ready((z1_out, logdet_out, eps))

    z1_ref, logdet_ref, eps_ref = _reference(z, logdet, params)
    assert jnp.allclose(z1_out, z1_ref)
    assert jnp.allclose(logdet_out, logdet_ref, rtol=1e-4, atol=1e-3)
    assert jnp.allclose(eps, eps_ref, rtol=1e-5, atol=1e-5)

    print("KERNEL_OK")
</pallas_src>

<mosaic_0001>
module attributes {stable_mosaic.version = 11 : i64} {
  func.func @_prior_kernel(%arg0: i32, %arg1: i32, %arg2: memref<1x1x4x256xf32, #tpu.memory_space<vmem>>, %arg3: memref<1x2x4x256xf32, #tpu.memory_space<vmem>>, %arg4: memref<2x4x1xf32, #tpu.memory_space<vmem>>, %arg5: memref<1x4x256xf32, #tpu.memory_space<vmem>>, %arg6: memref<1x1x1xf32, #tpu.memory_space<vmem>>) attributes {dimension_semantics = [#tpu.dimension_semantics<parallel>, #tpu.dimension_semantics<arbitrary>], iteration_bounds = array<i64: 2, 1>, scalar_prefetch = 0 : i64, scratch_operands = 0 : i64, tpu.core_type = #tpu.core_type<tc>, window_params = [{transform_indices = @transform_0, window_bounds = array<i64: 1, 1, 4, 256>}, {transform_indices = @transform_1, window_bounds = array<i64: 1, 2, 4, 256>}, {pipeline_mode = #tpu.pipeline_mode<synchronous>, transform_indices = @transform_2, window_bounds = array<i64: 2, 4, 1>}, {transform_indices = @transform_3, window_bounds = array<i64: 1, 4, 256>}, {transform_indices = @transform_4, window_bounds = array<i64: 1, 1, 1>}]} {
    %c0 = arith.constant 0 : index
    %c0_0 = arith.constant 0 : index
    %c0_1 = arith.constant 0 : index
    %c0_2 = arith.constant 0 : index
    %0 = vector.load %arg2[%c0, %c0_0, %c0_1, %c0_2] : memref<1x1x4x256xf32, #tpu.memory_space<vmem>>, vector<1x1x4x256xf32>
    %1 = vector.shape_cast %0 : vector<1x1x4x256xf32> to vector<1x4x256xf32>
    %c0_3 = arith.constant 0 : index
    %c0_4 = arith.constant 0 : index
    %c0_5 = arith.constant 0 : index
    %c0_6 = arith.constant 0 : index
    %2 = vector.load %arg3[%c0_3, %c0_4, %c0_5, %c0_6] : memref<1x2x4x256xf32, #tpu.memory_space<vmem>>, vector<1x1x4x256xf32>
    %3 = vector.shape_cast %2 : vector<1x1x4x256xf32> to vector<1x4x256xf32>
    %c0_7 = arith.constant 0 : index
    %c1 = arith.constant 1 : index
    %c0_8 = arith.constant 0 : index
    %c0_9 = arith.constant 0 : index
    %4 = vector.load %arg3[%c0_7, %c1, %c0_8, %c0_9] : memref<1x2x4x256xf32, #tpu.memory_space<vmem>>, vector<1x1x4x256xf32>
    %5 = vector.shape_cast %4 : vector<1x1x4x256xf32> to vector<1x4x256xf32>
    %c0_10 = arith.constant 0 : index
    %c0_11 = arith.constant 0 : index
    %c0_12 = arith.constant 0 : index
    %6 = vector.load %arg4[%c0_10, %c0_11, %c0_12] : memref<2x4x1xf32, #tpu.memory_space<vmem>>, vector<1x4x1xf32>
    %7 = vector.shape_cast %6 : vector<1x4x1xf32> to vector<4x1xf32>
    %8 = vector.shape_cast %7 : vector<4x1xf32> to vector<1x4x1xf32>
    %c1_13 = arith.constant 1 : index
    %c0_14 = arith.constant 0 : index
    %c0_15 = arith.constant 0 : index
    %9 = vector.load %arg4[%c1_13, %c0_14, %c0_15] : memref<2x4x1xf32, #tpu.memory_space<vmem>>, vector<1x4x1xf32>
    %10 = vector.shape_cast %9 : vector<1x4x1xf32> to vector<4x1xf32>
    %11 = vector.shape_cast %10 : vector<4x1xf32> to vector<1x4x1xf32>
    %12 = vector.broadcast %8 : vector<1x4x1xf32> to vector<1x4x256xf32>
    %13 = arith.addf %3, %12 : vector<1x4x256xf32>
    %14 = vector.broadcast %11 : vector<1x4x1xf32> to vector<1x4x256xf32>
    %15 = arith.addf %5, %14 : vector<1x4x256xf32>
    %16 = arith.subf %1, %13 : vector<1x4x256xf32>
    %cst = arith.constant 0.000000e+00 : f32
    %17 = vector.broadcast %cst : f32 to vector<1x4x256xf32>
    %18 = arith.subf %17, %15 : vector<1x4x256xf32>
    %19 = math.exp %18 : vector<1x4x256xf32>
    %20 = arith.mulf %16, %19 : vector<1x4x256xf32>
    %c0_16 = arith.constant 0 : index
    %c0_17 = arith.constant 0 : index
    %c0_18 = arith.constant 0 : index
    %21 = vector.load %arg5[%c0_16, %c0_17, %c0_18] : memref<1x4x256xf32, #tpu.memory_space<vmem>>, vector<1x4x256xf32>
    tpu.vector_store %arg5[%c0_16, %c0_17, %c0_18], %20 {strides = array<i32>} : memref<1x4x256xf32, #tpu.memory_space<vmem>>, vector<1x4x256xf32>,
    %22 = arith.mulf %20, %20 : vector<1x4x256xf32>
    %cst_19 = arith.constant 2.000000e+00 : f32
    %23 = vector.broadcast %cst_19 : f32 to vector<1x4x256xf32>
    %24 = arith.mulf %23, %15 : vector<1x4x256xf32>
    %25 = arith.addf %22, %24 : vector<1x4x256xf32>
    %cst_20 = arith.constant dense<0.000000e+00> : vector<1xf32>
    %26 = vector.multi_reduction <add>, %25, %cst_20 [1, 2] : vector<1x4x256xf32> to vector<1xf32>
    %27 = vector.shape_cast %26 : vector<1xf32> to vector<1x1x1xf32>
    %c0_i32 = arith.constant 0 : i32
    %28 = arith.cmpi eq, %arg1, %c0_i32 : i32
    %29 = arith.extui %28 : i1 to i32
    %c0_i32_21 = arith.constant 0 : i32
    %30 = arith.cmpi ne, %29, %c0_i32_21 : i32
    scf.if %30 {
      %cst_29 = arith.constant 0.000000e+00 : f32
      %36 = vector.broadcast %cst_29 : f32 to vector<1x1x1xf32>
      %c0_30 = arith.constant 0 : index
      %c0_31 = arith.constant 0 : index
      %c0_32 = arith.constant 0 : index
      %37 = vector.load %arg6[%c0_30, %c0_31, %c0_32] : memref<1x1x1xf32, #tpu.memory_space<vmem>>, vector<1x1x1xf32>
      tpu.vector_store %arg6[%c0_30, %c0_31, %c0_32], %36 {strides = array<i32>} : memref<1x1x1xf32, #tpu.memory_space<vmem>>, vector<1x1x1xf32>,
    } else {
    }
    %c0_22 = arith.constant 0 : index
    %c0_23 = arith.constant 0 : index
    %c0_24 = arith.constant 0 : index
    %31 = vector.load %arg6[%c0_22, %c0_23, %c0_24] : memref<1x1x1xf32, #tpu.memory_space<vmem>>, vector<1x1x1xf32>
    %cst_25 = arith.constant -5.000000e-01 : f32
    %32 = vector.broadcast %cst_25 : f32 to vector<1x1x1xf32>
    %33 = arith.mulf %32, %27 : vector<1x1x1xf32>
    %34 = arith.addf %31, %33 : vector<1x1x1xf32>
    %c0_26 = arith.constant 0 : index
    %c0_27 = arith.constant 0 : index
    %c0_28 = arith.constant 0 : index
    %35 = vector.load %arg6[%c0_26, %c0_27, %c0_28] : memref<1x1x1xf32, #tpu.memory_space<vmem>>, vector<1x1x1xf32>
    tpu.vector_store %arg6[%c0_26, %c0_27, %c0_28], %34 {strides = array<i32>} : memref<1x1x1xf32, #tpu.memory_space<vmem>>, vector<1x1x1xf32>,
    return
  }
  func.func @transform_0(%arg0: i32, %arg1: i32) -> (i32, i32, i32, i32) {
    %c1_i32 = arith.constant 1 : i32
    %c0_i32 = arith.constant 0 : i32
    %c0_i32_0 = arith.constant 0 : i32
    return %arg0, %c1_i32, %c0_i32, %arg1 : i32, i32, i32, i32
  }
  func.func @transform_1(%arg0: i32, %arg1: i32) -> (i32, i32, i32, i32) {
    %c0_i32 = arith.constant 0 : i32
    %c0_i32_0 = arith.constant 0 : i32
    %c0_i32_1 = arith.constant 0 : i32
    return %arg0, %c0_i32, %c0_i32_0, %arg1 : i32, i32, i32, i32
  }
  func.func @transform_2(%arg0: i32, %arg1: i32) -> (i32, i32, i32) {
    %c0_i32 = arith.constant 0 : i32
    %c0_i32_0 = arith.constant 0 : i32
    %c0_i32_1 = arith.constant 0 : i32
    %c0_i32_2 = arith.constant 0 : i32
    return %c0_i32, %c0_i32_0, %c0_i32_1 : i32, i32, i32
  }
  func.func @transform_3(%arg0: i32, %arg1: i32) -> (i32, i32, i32) {
    %c0_i32 = arith.constant 0 : i32
    %c0_i32_0 = arith.constant 0 : i32
    return %arg0, %c0_i32, %arg1 : i32, i32, i32
  }
  func.func @transform_4(%arg0: i32, %arg1: i32) -> (i32, i32, i32) {
    %c0_i32 = arith.constant 0 : i32
    %c0_i32_0 = arith.constant 0 : i32
    %c0_i32_1 = arith.constant 0 : i32
    return %arg0, %c0_i32, %c0_i32_0 : i32, i32, i32
  }
}

</mosaic_0001>

<bundles_post_ra>
// kernel: tpu_custom_call.1
= control target key start
LH: loop header
LB: loop body
LE: loop exit
PB: predicated region body
PF: predicated region fallthrough
CT: control target
= control target key end

     0   :  { %s958_s0 = inlined_call_operand.hbm [shape: f32[2,2,4,256], index: 0, kind: input, shape index: {}]   ;;  %s959_s1 = inlined_call_operand.hbm [shape: f32[2,2,4,256], index: 1, kind: input, shape index: {}]   ;;  %s960_s2 = inlined_call_operand.vmem [shape: f32[2,4,1], index: 2, kind: input, shape index: {}]   ;;  %s961_s3 = inlined_call_operand.hbm [shape: f32[2,4,256], index: 3, kind: output, shape index: {0}]   ;;  %s962_s4 = inlined_call_operand.vmem [shape: f32[2,1,1], index: 4, kind: output, shape index: {1}]  }
   0x1   :  { %963 = sst [smem:[#allocation11_spill]] %s958_s0 }
   0x2   :  { %10 = vsyncpa [#allocation3], 0 }
   0x3   :  { %12 = vsyncpa [#allocation3 + $0x1], 0 }
   0x4   :  { %13 = vsyncpa [#allocation6], 0 }
   0x5   :  { %15 = vsyncpa [#allocation6 + $0x1], 0 }
   0x6   :  { %16 = vsyncpa [#allocation4], 0 }
   0x7   :  { %18 = vsyncpa [#allocation4 + $0x1], 0  ;;  %s790_s15 = smov 0   ;;  %s792_s16 = smov 0  }
   0x8   :  { %s794_s17 = smov 0   ;;  %s796_s18 = smov 0  }
   0x9   :  { %s798_s19 = smov 0   ;;  %s800_s20 = smov 0  }
   0xa LB: > { %s513_s21 = sadd.s32 4294967295, %s758_s20   ;;  %s514_s22 = sadd.s32 4294967294, %s758_s20   ;;  %s758_s20 = sphi %s800_s20, %s24_s20   ;;  %s754_s19 = sphi %s798_s19, %s974_s19   ;;  %s750_s18 = sphi %s796_s18, %s973_s18   ;;  %s746_s17 = sphi %s794_s17, %s972_s17   ;;  %s742_s16 = sphi %s792_s16, %s971_s16   ;;  %s738_s15 = sphi %s790_s15, %s970_s15  }
   0xb   : > { %s36_s23 = sadd.s32 1, %s754_s19  ;;  %s45_s24 = sadd.s32 1, %s746_s17 }
   0xc   : > { %p38_p0 = scmp.ge.s32.totalorder %s36_s23, 2  ;;  %p52_p1 = scmp.ne.s32.totalorder %s746_s17, %s742_s16 }
   0xd   : > { %p53_p2 = scmp.eq.s32.totalorder %s758_s20, 0  ;;  %p58_p3 = scmp.ne.s32.totalorder %s742_s16, %s738_s15 }
   0xe   : > { %s976_s23 = smov (%p38_p0, %s36_s23), 0  ;;  %p59_p5 = scmp.eq.s32.totalorder %s513_s21, 0 }
   0xf   : > { %p831_p4 = por %p53_p2, %p52_p1  ;;  %s40_s26 = ssub.s32 %s754_s19, %s976_s23 }
  0x10   : > { %p133_p6 = scmp.eq.s32.totalorder %s513_s21, 1  ;;  %p43_p7 = scmp.eq.s32.totalorder %s40_s26, 0 }
  0x11   : > { %p837_p8 = por %p59_p5, %p58_p3  ;;  %p139_p10 = scmp.eq.s32.totalorder %s514_s22, 1 }
  0x12   : > { %p841_p9 = por %p133_p6, %p52_p1  ;;  %p516_p12 = scmp.ge.s32.totalorder %s758_s20, 2 }
  0x13   : > { %s846_s29 = scalar_select %p43_p7, %s746_s17, %s45_s24  }
  0x14   : > { %p848_p11 = por %p139_p10, %p58_p3  ;;  %p554_p13 = scmp.lt.s32.totalorder %s758_s20, 2 }
  0x15   : > { %s855_s5 = sand.u32 1, %s746_s17   ;;  %s534_s7 = sshll.u32 %s754_s19, 4 }
  0x16   : > { %s517_s6 = sshll.u32 %s855_s5, 3  ;;  %s968_s0 = sld [smem:[#allocation11_spill]] }
  0x17   : > { %s192_s11 = scalar_lea.vmem [#allocation2], %s517_s6  ;;  %p864_p0 = pnand %p554_p13, %p831_p4 }
  0x18   : > { %s204_s12 = sshll.u32 %s192_s11, 4  ;;  %s222_s26 = scalar_lea.hbm %s959_s1, %s534_s7  ;;  %s205_s12 = int_to_ptr.vmem [resolvable:$true] %s204_s12 }
  0x19   : > { %s223_s8 = sshll.u32 %s222_s26, 4  ;;  %s189_s9 = scalar_lea.sflag [#allocation3], %s855_s5  ;;  %s224_s8 = int_to_ptr.hbm [resolvable:$true] %s223_s8 }
  0x1a   : > { %p523_p1 = scmp.ge.s32.totalorder %s758_s20, 1  ;;  %p233_p2 = scmp.lt.s32.totalorder %s758_s20, 3 }
  0x1b   : > { %s520_s6 = sshll.u32 %s855_s5, 4  ;;  %s212_s11 = scalar_lea.sflag [#allocation6], %s855_s5 }
  0x1c   : > { %s423_s10 = scalar_lea.hbm %s968_s0, %s534_s7  ;;  %p234_p3 = pnand %p523_p1, %p233_p2 }
  0x1d   : > { %s424_s13 = scalar_lea.hbm %s423_s10, 8  ;;  %s215_s25 = scalar_lea.vmem [#allocation5], %s520_s6 }
  0x1e   : > { %s202_s14 = sshll.u32 %s424_s13, 4  ;;  %s225_s10 = sshll.u32 %s215_s25, 4  ;;  %s203_s14 = int_to_ptr.hbm [resolvable:$true] %s202_s14  ;;  %s226_s10 = int_to_ptr.vmem [resolvable:$true] %s225_s10 }
  0x1f   : > { %546 = dma.hbm_to_vmem [thread:$0]  (!%p864_p0), %s203_s14, 128, %s205_s12, %s189_s9  }
  0x20   : > { %s760_s13 = smov 128   ;;  %s761_s0 = smov 8  }
  0x21   : > { %549 = dma.hbm_to_vmem [thread:$0]  (!%p864_p0), %s224_s8, 256, %s226_s10, %s212_s11, %s760_s13, %s760_s13, %s761_s0  }
  0x22   : > { %237 = sbr.rel (%p234_p3) target bundleno = 325 (0x145), region = 32  ;;  %s881_s7 = sand.u32 (!%p234_p3), 1, %s742_s16  }
  0x23   : > { %s524_s12 = sshll.u32 (!%p234_p3), %s881_s7, 3  ;;  %s240_s14 = scalar_lea.sflag (!%p234_p3), [#allocation3], %s881_s7 }
  0x24   : > { %s887_s22 = scalar_lea.vmem (!%p234_p3), [#allocation2], %s524_s12 }
  0x27   : > { %725 = dma.done.wait (%p837_p8), %s240_s14, 128  }
  0x28   : > { %727 = vsyncadd (%p837_p8), %s240_s14, 4294967168  ;;  %s525_s0 = sshll.u32 %s881_s7, 4  ;;  %s250_s5 = scalar_lea.sflag [#allocation6], %s881_s7 }
  0x29   : > { %s253_s21 = scalar_lea.vmem [#allocation5], %s525_s0 }
  0x2a   : > { %729 = dma.done.wait (%p837_p8), %s250_s5, 256  }
  0x2b   : > { %731 = vsyncadd (%p837_p8), %s250_s5, 4294967040  ;;  %v762_v0 = vmov 0   ;;  %v528_v1 = vld [vmem:[%s960_s2 + $0x4] sm:$0xf]  ;;  %v297_v2 = vld [vmem:[%s960_s2] sm:$0xf] }
  0x2c   : > { %609 = vset.pattern.permute.xlu0 %v762_v0  ;;  %p290_p4 = scmp.lt.s32.totalorder %s750_s18, 1  ;;  %v763_v3 = vmov 839922192   ;;  %v527_v7 = vld [vmem:[%s253_s21 + $0x8] sm:$0xff]  ;;  %vm351_vm0 = vcmask 0   ;;  %v764_v9 = vmov 0.0  }
  0x2d   : > { %312 = vperm.xlu0 %609, %v528_v1   ;;  %v305_v4 = vunpack.c.l.s4 %v763_v3  ;;  %v294_v14 = vld [vmem:[%s253_s21] sm:$0xff]  ;;  %v293_v16 = vld [vmem:[%s887_s22] sm:$0xff]  ;;  %s281_s11 = scalar_lea.vmem [#allocation7], %s524_s12  ;;  %vm335_vm1 = vcmask 1043456   ;;  %s536_s13 = sshll.u32 %s750_s18, 3 }
  0x2e   : > { %s291_s6 = scalar_select %p290_p4, %s750_s18, 1 }
  0x2f   : > { %v306_v5 = vunpack.c.0.s8 %v305_v4  ;;  %s375_s0 = scalar_lea.hbm %s961_s3, %s536_s13  ;;  %s377_s5 = sshll.u32 %s281_s11, 4  ;;  %s378_s5 = int_to_ptr.vmem [resolvable:$true] %s377_s5 }
  0x30   : > { %s910_s10 = scalar_lea.vmem %s962_s4, %s291_s6  ;;  %s379_s21 = sshll.u32 %s375_s0, 4  ;;  %s380_s21 = int_to_ptr.hbm [resolvable:$true] %s379_s21 }
  0x31   : > { %352 = vst.msk [vmem:[%s910_s10] sm:$0x1] %vm351_vm0, %v764_v9  ;;  %s359_s12 = scalar_lea.sflag [#allocation4], %s881_s7  ;;  %s686_s24 = sshra.s32 %s380_s21, 4  ;;  %s687_s24 = int_to_ptr.hbm [resolvable:$true] %s686_s24 }
  0x32   : > { %s688_s26 = scalar_lea.hbm %s687_s24, 8  ;;  %s692_s18 = scalar_lea.hbm %s961_s3, 16 }
  0x33   : > { %p689_p5 = scmp.ne.s32.totalorder %s687_s24, %s688_s26  ;;  %p693_p8 = scmp.lt.s32.totalorder %s687_s24, %s961_s3 }
  0x34   : > { %p694_p10 = scmp.lt.s32.totalorder %s692_s18, %s688_s26 }
  0x35   : > { %302 = vperm.xlu0 %609, %v297_v2   ;;  %p690_p6 = pnand %p689_p5, %p841_p9 }
  0x36   : > { %p695_p13 = por %p694_p10, %p693_p8 }
  0x37   : > { %p691_p7 = pneg %p690_p6 }
  0x39   : > { %p696_p0 = pnand %p695_p13, %p691_p7 }
  0x9f   : > { %v313_v6 = vpop.permute.xlu0 %312 }
  0xa0   : > { %v317_v8 = vperm.slane %v313_v6, %v306_v5 }
  0xa2   : > { %v319_v10 = vadd.f32 %v527_v7, %v317_v8 }
  0xa4   : > { %v321_v11 = vsub.f32 0.0, %v319_v10  ;;  %v327_v21 = vmul.f32 2.0, %v319_v10 }
  0xa6   : > { %v322_v12 = vmul.f32 1.442695, %v321_v11 }
  0xa7   : > { %v303_v13 = vpop.permute.xlu0 %302 }
  0xa8   : > { %610 = vpow2.f32 %v322_v12  ;;  %v307_v15 = vperm.slane %v303_v13, %v306_v5 }
  0xaa   : > { %v309_v17 = vadd.f32 %v307_v15, %v294_v14 }
  0xac   : > { %v320_v18 = vsub.f32 %v293_v16, %v309_v17 }
  0xae   : > { %v611_v19 = vpop.eup %610 }
  0xaf   : > { %v324_v20 = vmul.f32 %v611_v19, %v320_v18 }
  0xb1   : > { %v326_v22 = vmul.f32 %v324_v20, %v324_v20  ;;  %325 = vst [vmem:[%s281_s11] sm:$0xff] %v324_v20 }
  0xb3   : > { %v328_v23 = vadd.f32 %v327_v21, %v326_v22 }
  0xb5   : > { %330 = vst [vmem:[#allocation1] ss:$2 sm:$0xff] %v328_v23 }
  0xbc   : > { %v331_v24 = vld.sshfl [vmem:[#allocation1] sm:$0xff pattern:$0x75316420]  ;;  %v332_v25 = vld.sshfl [vmem:[#allocation1 + $0x8] sm:$0xff pattern:$0x75316420] }
  0xbd   : > { %v336_v26 = vsel %vm335_vm1, %v331_v24, 0.0  ;;  %v337_v27 = vsel %vm335_vm1, %v332_v25, 0.0 }
  0xbe   : > { %v338_v28 = vadd.f32 %v337_v27, %v336_v26 }
  0xc0   : > { %339 = vadd.xlane.f32.xlu1 %v338_v28 }
  0xc1   : > { %699 = shalt.err (!%p696_p0)
}
  0xc2   : > { %541 = dma.vmem_to_hbm [thread:$0]  (%p841_p9), %s378_s5, 128, %s380_s21, %s359_s12   ;;  %v353_v36 = vld [vmem:[%s910_s10] sm:$0x1] }
 0x133   : > { %v340_v29 = vpop.xlane.xlu1 %339 }
 0x134   : > { %v341_v30 = vrot.slane %v340_v29, 4 }
 0x136   : > { %v342_v31 = vadd.f32 %v341_v30, %v340_v29 }
 0x138   : > { %v343_v32 = vrot.slane %v342_v31, 2 }
 0x13a   : > { %v344_v33 = vadd.f32 %v343_v32, %v342_v31 }
 0x13c   : > { %v345_v34 = vrot.slane %v344_v33, 1 }
 0x13e   : > { %v346_v35 = vadd.f32 %v345_v34, %v344_v33 }
 0x140   : > { %v354_v37 = vmul.f32 -0.5, %v346_v35 }
 0x142   : > { %v355_v38 = vadd.f32 %v354_v37, %v353_v36 }
 0x144   : > { %357 = vst.msk [vmem:[%s910_s10] sm:$0x1] %vm351_vm0, %v355_v38 }
 0x145 PF: > { %s394_s28 = sand.u32 1, %s738_s15   ;;  %p551_p9 = pnand %p516_p12, %p848_p11 }
 0x146   : > { %s395_s7 = scalar_lea.sflag [#allocation4], %s394_s28 }
 0x147   : > { %p552_p1 = pneg %p551_p9 }
 0x149   : > { %733 = dma.done.wait (%p552_p1), %s395_s7, 128  }
 0x14a   : > { %735 = vsyncadd (%p552_p1), %s395_s7, 4294967168  ;;  %s24_s20 = sadd.s32 1, %s758_s20   ;;  %s970_s15 = smov %s742_s16 }
 0x14b   : > { %p21_p2 = scmp.ge.s32.totalorder %s24_s20, 4   ;;  %s971_s16 = smov %s746_s17 }
 0x14c   : > { %s972_s17 = smov %s846_s29  ;;  %s973_s18 = smov %s754_s19 }
 0x14d   : > { %s974_s19 = smov %s976_s23  ;;  %23 = sbr.rel (!%p21_p2) target bundleno = 10 (0xa), region = 108 }
 0x152   :  { %407 = vsyncpa [#allocation3], 1 }
 0x153   :  { %409 = vsyncpa [#allocation3 + $0x1], 1 }
 0x154   :  { %410 = vsyncpa [#allocation6], 1 }
 0x155   :  { %412 = vsyncpa [#allocation6 + $0x1], 1 }
 0x156   :  { %413 = vsyncpa [#allocation4], 1 }
 0x157   :  { %415 = vsyncpa [#allocation4 + $0x1], 1 }

</bundles_post_ra>
